<compile_context>
chip_gen: v7x
topology: tpu7x:2x2x1
jax: 0.10.0
libtpu: 0.0.40
codegen_flags: <defaults>
</compile_context>

<pallas_src>
import math

import jax
import jax.numpy as jnp
from jax.experimental import pallas as pl
from jax.experimental.pallas import tpu as pltpu


# bf16 MXU operands (f32 accumulation).  Set to jnp.float32 to recover exact
# f32-reference matmuls (only matters for near-ties in the top-k selection).
MXU_DTYPE = jnp.bfloat16


# ----------------------------------------------------------------------------
# Kernel 1: per-capsule activation norms  ||W1 @ x_n||_2   (selection path)
# ----------------------------------------------------------------------------
def _norm_kernel(x_ref, w1t_ref, au_ref):
    # x_ref   : (1, N, Din) f32
    # w1t_ref : (Din, Dout) MXU_DTYPE   (W1 pre-transposed in the wrapper)
    # au_ref  : (1, N, 1)   f32
    x = x_ref[0]                                                      # (N, Din)
    u = jnp.dot(x.astype(w1t_ref.dtype), w1t_ref[...],
                preferred_element_type=jnp.float32)                   # (N, Dout)
    au_ref[0] = jnp.sqrt(jnp.sum(u * u, axis=-1, keepdims=True))      # (N, 1)


def _norm_call(x_t, w1t):
    B, N, Din = x_t.shape
    Dout = w1t.shape[1]
    return pl.pallas_call(
        _norm_kernel,
        out_shape=jax.ShapeDtypeStruct((B, N, 1), jnp.float32),
        grid=(B,),
        in_specs=[
            pl.BlockSpec((1, N, Din), lambda b: (b, 0, 0)),
            pl.BlockSpec((Din, Dout), lambda b: (0, 0)),
        ],
        out_specs=pl.BlockSpec((1, N, 1), lambda b: (b, 0, 0)),
        compiler_params=pltpu.CompilerParams(dimension_semantics=("parallel",)),
    )(x_t, w1t)


# ----------------------------------------------------------------------------
# Kernel 2: fused projection + masked top-k routing
# ----------------------------------------------------------------------------
def _make_route_kernel(num_units):
    def _route_kernel(x_ref, w1t_ref, mask_ref, o_ref):
        # x_ref    : (1, N, Din)  input capsules (f32)
        # w1t_ref  : (Din, Dout)  W1^T (MXU dtype)
        # mask_ref : (1, N, 1)    1.0 for capsules in the top-k set, else 0.0
        # o_ref    : (1, U, Dout) pose_out
        x = x_ref[0]                                                  # (N, Din)
        u_hat = jnp.dot(x.astype(w1t_ref.dtype), w1t_ref[...],
                        preferred_element_type=jnp.float32)           # (N, Dout)
        ax = jnp.sqrt(jnp.sum(x * x, axis=-1, keepdims=True))         # (N, 1) ||x_n||

        # Softmax over num_units identical logit copies == 1/num_units exactly,
        # so the W2/b2 logit path cancels and coeff_n = a_n / sum_sel(a_n).
        w = mask_ref[0] * ax                                          # (N, 1)
        num = jnp.sum(w * u_hat, axis=0, keepdims=True)               # (1, Dout)
        den = jnp.sum(w, keepdims=True)                               # (1, 1)
        den = jnp.where(den > 0.0, den, jnp.ones_like(den))           # k==0 guard
        pose = num * pl.reciprocal(den, approx=True)                  # (1, Dout)
        o_ref[0] = jnp.broadcast_to(pose, (num_units, pose.shape[-1]))

    return _route_kernel


def _route_call(x_t, w1t, mask, num_units):
    B, N, Din = x_t.shape
    Dout = w1t.shape[1]
    return pl.pallas_call(
        _make_route_kernel(num_units),
        out_shape=jax.ShapeDtypeStruct((B, num_units, Dout), jnp.float32),
        grid=(B,),
        in_specs=[
            pl.BlockSpec((1, N, Din), lambda b: (b, 0, 0)),
            pl.BlockSpec((Din, Dout), lambda b: (0, 0)),
            pl.BlockSpec((1, N, 1), lambda b: (b, 0, 0)),
        ],
        out_specs=pl.BlockSpec((1, num_units, Dout), lambda b: (b, 0, 0)),
        compiler_params=pltpu.CompilerParams(dimension_semantics=("parallel",)),
    )(x_t, w1t, mask)


# ----------------------------------------------------------------------------
# Wrapper = fSelfRouting2d.forward  (fully jit-able; no host syncs)
# ----------------------------------------------------------------------------
def fself_routing_2d(x, W1, W2, b2, num_units):
    """x: (B, in_size, N) f32; W1/W2: (out_size, in_size); b2: (out_size,).

    Returns pose_out of shape (B, num_units, out_size).

    W2 / b2 are accepted for interface parity with the PyTorch module but have
    no effect on the forward output: the reference softmaxes over num_units
    identical copies of the logit, which is exactly 1/num_units.
    """
    B, Din, N = x.shape
    Dout = W1.shape[0]
    _ = (W2, b2)  # dead in the forward output (see docstring)

    x_t = jnp.transpose(x, (0, 2, 1)).astype(jnp.float32)    # (B, N, Din)
    w1t = jnp.transpose(W1).astype(MXU_DTYPE)                # (Din, Dout)

    # --- kernel 1: capsule activations ||u_hat_n|| ---------------------------
    au = _norm_call(x_t, w1t)[..., 0]                        # (B, N)

    # --- top-k selection glue (static shapes, stays on device) ---------------
    vals, order = jax.lax.top_k(au, N)                       # full descending sort
    amax = vals[:, 0]
    amed = vals[:, N // 2]        # lower median of the norms (== torch.median)
    prop = jnp.mean(amed / amax)  # no eps guard, as in the reference
    # TODO(synk): the reference does a host-side `print(prop)` here; omitted to
    # keep stdout clean and avoid forcing a device->host sync.
    k = (prop * N).astype(jnp.int32)          # int(knum) truncation, on device
    rank = jnp.argsort(order, axis=1)         # rank[b, n] = descending rank of capsule n
    mask = (rank < k).astype(jnp.float32)[..., None]          # (B, N, 1)

    # --- kernel 2: fused projection + masked top-k routing -------------------
    return _route_call(x_t, w1t, mask, num_units)             # (B, U, Dout)


if __name__ == "__main__":
    B, in_size, out_size, N, num_units = 2, 32, 16, 64, 4

    key = jax.random.PRNGKey(0)
    kw1, kw2, kx = jax.random.split(key, 3)

    # deterministic kaiming-uniform-style init (synthetic; no checkpoint load)
    bound = math.sqrt(6.0 / in_size)
    W1 = jax.random.uniform(kw1, (out_size, in_size), jnp.float32, -bound, bound)
    W2 = jax.random.uniform(kw2, (out_size, in_size), jnp.float32, -bound, bound)
    b2 = jnp.zeros((out_size,), jnp.float32)   # nn.init.constant_(b2, 0)

    x = jax.random.normal(kx, (B, in_size, N), jnp.float32)

    fwd = jax.jit(fself_routing_2d, static_argnums=(4,))
    pose = fwd(x, W1, W2, b2, num_units)
    jax.block_until_ready(pose)

    assert pose.shape == (B, num_units, out_size)
    assert bool(jnp.all(jnp.isfinite(pose)))
    print("KERNEL_OK")
</pallas_src>

<mosaic_0001>
module attributes {stable_mosaic.version = 11 : i64} {
  func.func @_norm_kernel(%arg0: i32, %arg1: memref<1x64x32xf32, #tpu.memory_space<vmem>>, %arg2: memref<32x16xbf16, #tpu.memory_space<vmem>>, %arg3: memref<1x64x1xf32, #tpu.memory_space<vmem>>) attributes {dimension_semantics = [#tpu.dimension_semantics<parallel>], iteration_bounds = array<i64: 2>, scalar_prefetch = 0 : i64, scratch_operands = 0 : i64, tpu.core_type = #tpu.core_type<tc>, window_params = [{transform_indices = @transform_0, window_bounds = array<i64: 1, 64, 32>}, {pipeline_mode = #tpu.pipeline_mode<synchronous>, transform_indices = @transform_1, window_bounds = array<i64: 32, 16>}, {transform_indices = @transform_2, window_bounds = array<i64: 1, 64, 1>}]} {
    %c0 = arith.constant 0 : index
    %c0_0 = arith.constant 0 : index
    %c0_1 = arith.constant 0 : index
    %0 = vector.load %arg1[%c0, %c0_0, %c0_1] : memref<1x64x32xf32, #tpu.memory_space<vmem>>, vector<1x64x32xf32>
    %1 = vector.shape_cast %0 : vector<1x64x32xf32> to vector<64x32xf32>
    %2 = arith.truncf %1 : vector<64x32xf32> to vector<64x32xbf16>
    %c0_2 = arith.constant 0 : index
    %c0_3 = arith.constant 0 : index
    %3 = vector.load %arg2[%c0_2, %c0_3] : memref<32x16xbf16, #tpu.memory_space<vmem>>, vector<32x16xbf16>
    %cst = arith.constant dense<0.000000e+00> : vector<64x16xf32>
    %4 = tpu.matmul %2, %3, %cst {dimension_numbers = #tpu.dot_dimension_numbers<[1], [0], [0], [1], [0, 0, 1, 1], [], []>} : vector<64x32xbf16>, vector<32x16xbf16>, vector<64x16xf32> -> vector<64x16xf32>
    %5 = arith.mulf %4, %4 : vector<64x16xf32>
    %cst_4 = arith.constant dense<0.000000e+00> : vector<64xf32>
    %6 = vector.multi_reduction <add>, %5, %cst_4 [1] : vector<64x16xf32> to vector<64xf32>
    %7 = vector.shape_cast %6 : vector<64xf32> to vector<64x1xf32>
    %8 = math.sqrt %7 : vector<64x1xf32>
    %c0_5 = arith.constant 0 : index
    %c0_6 = arith.constant 0 : index
    %c0_7 = arith.constant 0 : index
    %9 = vector.load %arg3[%c0_5, %c0_6, %c0_7] : memref<1x64x1xf32, #tpu.memory_space<vmem>>, vector<1x64x1xf32>
    %10 = vector.shape_cast %9 : vector<1x64x1xf32> to vector<64x1xf32>
    %11 = vector.shape_cast %8 : vector<64x1xf32> to vector<1x64x1xf32>
    tpu.vector_store %arg3[%c0_5, %c0_6, %c0_7], %11 {strides = array<i32>} : memref<1x64x1xf32, #tpu.memory_space<vmem>>, vector<1x64x1xf32>,
    return
  }
  func.func @transform_0(%arg0: i32) -> (i32, i32, i32) {
    %c0_i32 = arith.constant 0 : i32
    %c0_i32_0 = arith.constant 0 : i32
    %c0_i32_1 = arith.constant 0 : i32
    return %arg0, %c0_i32, %c0_i32_0 : i32, i32, i32
  }
  func.func @transform_1(%arg0: i32) -> (i32, i32) {
    %c0_i32 = arith.constant 0 : i32
    %c0_i32_0 = arith.constant 0 : i32
    %c0_i32_1 = arith.constant 0 : i32
    return %c0_i32, %c0_i32_0 : i32, i32
  }
  func.func @transform_2(%arg0: i32) -> (i32, i32, i32) {
    %c0_i32 = arith.constant 0 : i32
    %c0_i32_0 = arith.constant 0 : i32
    %c0_i32_1 = arith.constant 0 : i32
    return %arg0, %c0_i32, %c0_i32_0 : i32, i32, i32
  }
}

module attributes {stable_mosaic.version = 11 : i64} {
  func.func @_route_kernel(%arg0: i32, %arg1: memref<1x64x32xf32, #tpu.memory_space<vmem>>, %arg2: memref<32x16xbf16, #tpu.memory_space<vmem>>, %arg3: memref<1x64x1xf32, #tpu.memory_space<vmem>>, %arg4: memref<1x4x16xf32, #tpu.memory_space<vmem>>) attributes {dimension_semantics = [#tpu.dimension_semantics<parallel>], iteration_bounds = array<i64: 2>, scalar_prefetch = 0 : i64, scratch_operands = 0 : i64, tpu.core_type = #tpu.core_type<tc>, window_params = [{transform_indices = @transform_0, window_bounds = array<i64: 1, 64, 32>}, {pipeline_mode = #tpu.pipeline_mode<synchronous>, transform_indices = @transform_1, window_bounds = array<i64: 32, 16>}, {transform_indices = @transform_2, window_bounds = array<i64: 1, 64, 1>}, {transform_indices = @transform_3, window_bounds = array<i64: 1, 4, 16>}]} {
    %c0 = arith.constant 0 : index
    %c0_0 = arith.constant 0 : index
    %c0_1 = arith.constant 0 : index
    %0 = vector.load %arg1[%c0, %c0_0, %c0_1] : memref<1x64x32xf32, #tpu.memory_space<vmem>>, vector<1x64x32xf32>
    %1 = vector.shape_cast %0 : vector<1x64x32xf32> to vector<64x32xf32>
    %2 = arith.truncf %1 : vector<64x32xf32> to vector<64x32xbf16>
    %c0_2 = arith.constant 0 : index
    %c0_3 = arith.constant 0 : index
    %3 = vector.load %arg2[%c0_2, %c0_3] : memref<32x16xbf16, #tpu.memory_space<vmem>>, vector<32x16xbf16>
    %cst = arith.constant dense<0.000000e+00> : vector<64x16xf32>
    %4 = tpu.matmul %2, %3, %cst {dimension_numbers = #tpu.dot_dimension_numbers<[1], [0], [0], [1], [0, 0, 1, 1], [], []>} : vector<64x32xbf16>, vector<32x16xbf16>, vector<64x16xf32> -> vector<64x16xf32>
    %5 = arith.mulf %1, %1 : vector<64x32xf32>
    %cst_4 = arith.constant dense<0.000000e+00> : vector<64xf32>
    %6 = vector.multi_reduction <add>, %5, %cst_4 [1] : vector<64x32xf32> to vector<64xf32>
    %7 = vector.shape_cast %6 : vector<64xf32> to vector<64x1xf32>
    %8 = math.sqrt %7 : vector<64x1xf32>
    %c0_5 = arith.constant 0 : index
    %c0_6 = arith.constant 0 : index
    %c0_7 = arith.constant 0 : index
    %9 = vector.load %arg3[%c0_5, %c0_6, %c0_7] : memref<1x64x1xf32, #tpu.memory_space<vmem>>, vector<1x64x1xf32>
    %10 = vector.shape_cast %9 : vector<1x64x1xf32> to vector<64x1xf32>
    %11 = arith.mulf %10, %8 : vector<64x1xf32>
    %12 = vector.broadcast %11 : vector<64x1xf32> to vector<64x16xf32>
    %13 = arith.mulf %12, %4 : vector<64x16xf32>
    %cst_8 = arith.constant dense<0.000000e+00> : vector<16xf32>
    %14 = vector.multi_reduction <add>, %13, %cst_8 [0] : vector<64x16xf32> to vector<16xf32>
    %15 = vector.shape_cast %14 : vector<16xf32> to vector<1x16xf32>
    %16 = vector.shape_cast %11 : vector<64x1xf32> to vector<1x64x1xf32>
    %cst_9 = arith.constant dense<0.000000e+00> : vector<1xf32>
    %17 = vector.multi_reduction <add>, %16, %cst_9 [1, 2] : vector<1x64x1xf32> to vector<1xf32>
    %18 = vector.shape_cast %17 : vector<1xf32> to vector<1x1x1xf32>
    %19 = vector.extract %18[0, 0, 0] : f32 from vector<1x1x1xf32>
    %20 = vector.broadcast %19 : f32 to vector<1x1xf32>
    %cst_10 = arith.constant 0.000000e+00 : f32
    %21 = vector.broadcast %cst_10 : f32 to vector<1x1xf32>
    %22 = arith.cmpf ogt, %20, %21 : vector<1x1xf32>
    %cst_11 = arith.constant 1.000000e+00 : f32
    %23 = vector.broadcast %cst_11 : f32 to vector<1x1xf32>
    %24 = arith.select %22, %20, %23 : vector<1x1xi1>, vector<1x1xf32>
    %25 = tpu.reciprocal %24 {approx = true} : vector<1x1xf32> -> vector<1x1xf32>
    %26 = vector.broadcast %25 : vector<1x1xf32> to vector<1x16xf32>
    %27 = arith.mulf %15, %26 : vector<1x16xf32>
    %28 = vector.shape_cast %27 : vector<1x16xf32> to vector<1x16xf32>
    %29 = vector.broadcast %28 : vector<1x16xf32> to vector<4x16xf32>
    %c0_12 = arith.constant 0 : index
    %c0_13 = arith.constant 0 : index
    %c0_14 = arith.constant 0 : index
    %30 = vector.load %arg4[%c0_12, %c0_13, %c0_14] : memref<1x4x16xf32, #tpu.memory_space<vmem>>, vector<1x4x16xf32>
    %31 = vector.shape_cast %30 : vector<1x4x16xf32> to vector<4x16xf32>
    %32 = vector.shape_cast %29 : vector<4x16xf32> to vector<1x4x16xf32>
    tpu.vector_store %arg4[%c0_12, %c0_13, %c0_14], %32 {strides = array<i32>} : memref<1x4x16xf32, #tpu.memory_space<vmem>>, vector<1x4x16xf32>,
    return
  }
  func.func @transform_0(%arg0: i32) -> (i32, i32, i32) {
    %c0_i32 = arith.constant 0 : i32
    %c0_i32_0 = arith.constant 0 : i32
    %c0_i32_1 = arith.constant 0 : i32
    return %arg0, %c0_i32, %c0_i32_0 : i32, i32, i32
  }
  func.func @transform_1(%arg0: i32) -> (i32, i32) {
    %c0_i32 = arith.constant 0 : i32
    %c0_i32_0 = arith.constant 0 : i32
    %c0_i32_1 = arith.constant 0 : i32
    return %c0_i32, %c0_i32_0 : i32, i32
  }
  func.func @transform_2(%arg0: i32) -> (i32, i32, i32) {
    %c0_i32 = arith.constant 0 : i32
    %c0_i32_0 = arith.constant 0 : i32
    %c0_i32_1 = arith.constant 0 : i32
    return %arg0, %c0_i32, %c0_i32_0 : i32, i32, i32
  }
  func.func @transform_3(%arg0: i32) -> (i32, i32, i32) {
    %c0_i32 = arith.constant 0 : i32
    %c0_i32_0 = arith.constant 0 : i32
    %c0_i32_1 = arith.constant 0 : i32
    return %arg0, %c0_i32, %c0_i32_0 : i32, i32, i32
  }
}

</mosaic_0001>

<bundles_post_ra>
// kernel: fself_routing_2d.2
= control target key start
LH: loop header
LB: loop body
LE: loop exit
PB: predicated region body
PF: predicated region fallthrough
CT: control target
= control target key end

     0   :  { %s494_s9 = smov 0   ;;  %s554_s0 = inlined_call_operand.vmem [shape: f32[2,64,32], index: 0, kind: input, shape index: {}]   ;;  %s555_s1 = inlined_call_operand.vmem [shape: bf16[32,16], index: 1, kind: input, shape index: {}]   ;;  %s556_s2 = inlined_call_operand.vmem [shape: f32[2,64,1], index: 2, kind: output, shape index: {}]  }
   0x1 LB: > { %s404_s10 = sadd.s32 4294967295, %s477_s9   ;;  %p408_p0 = scmp.ge.s32.totalorder %s477_s9, 1  ;;  %s477_s9 = sphi %s494_s9, %s12_s9  }
   0x2   : > { %p112_p1 = scmp.lt.s32.totalorder %s477_s9, 3 }
   0x4   : > { %p113_p2 = pnand %p408_p0, %p112_p1 }
   0x5   : > { %v453_v0 = vld [vmem:[%s555_s1] sm:$0xff] (!%p113_p2)   ;;  %p134_p3 = scmp.lt.s32.totalorder (!%p113_p2), %s404_s10, 1  ;;  %v454_v1 = vld [vmem:[%s555_s1 + $0x8] sm:$0xff] (!%p113_p2)   ;;  %vm173_vm0 = vcmask (!%p113_p2), 261120   ;;  %vm259_vm1 = vcmask (!%p113_p2), 130048   ;;  %vm340_vm2 = vcmask (!%p113_p2), 7168  }
   0x6   : > { %116 = sbr.rel (%p113_p2) target bundleno = 406 (0x196), region = 28  ;;  %429 = vmatprep.subr.bf16.mxu0 (!%p113_p2), %v453_v0  ;;  %441 = vmatprep.subr.bf16.mxu1 (!%p113_p2), %v453_v0 }
   0x7   : > { %430 = vmatpush3.bf16.msra.mxu0 (!%p113_p2), %v453_v0  ;;  %443 = vmatpush3.bf16.msra.mxu1 (!%p113_p2), %v453_v0 }
   0x8   : > { %431 = vmatprep.subr.bf16.mxu0 (!%p113_p2), %v454_v1  ;;  %442 = vmatprep.subr.bf16.mxu1 (!%p113_p2), %v454_v1 }
   0xb   : > { %432 = vmatpush3.bf16.msra.mxu0 (!%p113_p2), %v454_v1  ;;  %444 = vmatpush3.bf16.msra.mxu1 (!%p113_p2), %v454_v1 }
   0xd   : > { %s558_s10 = smov (!%p134_p3, %s404_s10), 1 }
   0xe   : > { %s421_s15 = sshll.u32 %s558_s10, 6 }
   0xf   : > { %s138_s18 = scalar_lea.vmem %s554_s0, %s421_s15  ;;  %s533_s21 = scalar_lea.vmem %s556_s2, %s421_s15 }
  0x10   : > { %v145_v2 = vld [vmem:[%s138_s18] sm:$0xff]  ;;  %v146_v3 = vld [vmem:[%s138_s18 + $0x8] sm:$0xff]  ;;  %v147_v4 = vld [vmem:[%s138_s18 + $0x10] sm:$0xff] }
  0x11   : > { %v153_v5 = vpack.c.bf16 %v146_v3, %v145_v2  ;;  %v148_v6 = vld [vmem:[%s138_s18 + $0x18] sm:$0xff]  ;;  %v149_v7 = vld [vmem:[%s138_s18 + $0x20] sm:$0xff]  ;;  %v150_v8 = vld [vmem:[%s138_s18 + $0x28] sm:$0xff] }
  0x12   : > { %v154_v9 = vpack.c.bf16 %v148_v6, %v147_v4  ;;  %v155_v10 = vpack.c.bf16 %v150_v8, %v149_v7  ;;  %v151_v11 = vld [vmem:[%s138_s18 + $0x30] sm:$0xff]  ;;  %v152_v12 = vld [vmem:[%s138_s18 + $0x38] sm:$0xff] }
  0x13   : > { %433 = vmatprep.mubr.msk.bf16.mxu0 %vm173_vm0, %v153_v5  ;;  %v156_v13 = vpack.c.bf16 %v152_v12, %v151_v11 }
  0x14   : > { %434 = vmatmul.mubr.msk.bf16.vlgmr.msra.gmra.mrb[0].mxu0 %vm173_vm0, %v154_v9  ;;  %437 = vmatprep.mubr.msk.bf16.mxu1 %vm173_vm0, %v155_v10 }
  0x15   : > { %438 = vmatmul.mubr.msk.bf16.vlgmr.msra.gmra.mrb[0].mxu1 %vm173_vm0, %v156_v13 }
  0xe7   : > { %v435_v14 = vpop.f32.mrb[0].mxu0 }
  0xe8   : > { %v253_v15 = vmul.f32 %v435_v14, %v435_v14  ;;  %v220_v16 = vpop.f32.mrb[1].mxu0  ;;  %v439_v17 = vpop.f32.mrb[0].mxu1 }
  0xe9   : > { %v251_v18 = vmul.f32 %v220_v16, %v220_v16  ;;  %v436_v19 = vpop.f32.mrb[2].mxu0  ;;  %v236_v20 = vpop.f32.mrb[1].mxu1  ;;  %v257_v34 = vmul.f32 %v439_v17, %v439_v17 }
  0xea   : > { %v254_v21 = vmul.f32 %v436_v19, %v436_v19  ;;  %v255_v22 = vmul.f32 %v236_v20, %v236_v20  ;;  %v223_v23 = vpop.f32.mrb[3].mxu0  ;;  %v440_v24 = vpop.f32.mrb[2].mxu1  ;;  %v266_v25 = vsel %vm259_vm1, %v253_v15, 0.0 }
  0xeb   : > { %v239_v26 = vpop.f32.mrb[3].mxu1  ;;  %267 = vadd.xlane.f32.xlu1 %v266_v25  ;;  %v260_v27 = vsel %vm259_vm1, %v251_v18, 0.0  ;;  %v252_v31 = vmul.f32 %v223_v23, %v223_v23  ;;  %v258_v32 = vmul.f32 %v440_v24, %v440_v24  ;;  %v278_v37 = vsel %vm259_vm1, %v257_v34, 0.0 }
  0xec   : > { %261 = vadd.xlane.f32.xlu0 %v260_v27  ;;  %v272_v28 = vsel %vm259_vm1, %v255_v22, 0.0  ;;  %v256_v29 = vmul.f32 %v239_v26, %v239_v26  ;;  %v269_v30 = vsel %vm259_vm1, %v254_v21, 0.0 }
  0xed   : > { %v263_v35 = vsel %vm259_vm1, %v252_v31, 0.0  ;;  %v281_v36 = vsel %vm259_vm1, %v258_v32, 0.0 }
  0xee   : > { %v275_v33 = vsel %vm259_vm1, %v256_v29, 0.0 }
  0xef   : > { %270 = vadd.xlane.f32.xlu1 %v269_v30 }
  0xf0   : > { %273 = vadd.xlane.f32.xlu0 %v272_v28 }
  0xf3   : > { %276 = vadd.xlane.f32.xlu1 %v275_v33 }
  0xf4   : > { %264 = vadd.xlane.f32.xlu0 %v263_v35 }
  0xf7   : > { %282 = vadd.xlane.f32.xlu1 %v281_v36 }
  0xf8   : > { %279 = vadd.xlane.f32.xlu0 %v278_v37 }
 0x178   : > { %v268_v38 = vpop.xlane.xlu1 %267 }
 0x179   : > { %455 = vrsqrt.f32 %v268_v38  ;;  %v262_v39 = vpop.xlane.xlu0 %261  ;;  %vm300_vm3 = vcmp.eq.f32.partialorder %v268_v38, inf  ;;  %vm302_vm4 = vcmp.eq.f32.partialorder %v268_v38, 0.0  ;;  %v303_v48 = vand.u32 2147483648, %v268_v38 }
 0x17a   : > { %457 = vrsqrt.f32 %v262_v39  ;;  %vm286_vm5 = vcmp.eq.f32.partialorder %v262_v39, inf  ;;  %v289_v52 = vand.u32 2147483648, %v262_v39  ;;  %vm288_vm6 = vcmp.eq.f32.partialorder %v262_v39, 0.0 }
 0x17c   : > { %v271_v40 = vpop.xlane.xlu1 %270 }
 0x17d   : > { %459 = vrsqrt.f32 %v271_v40  ;;  %v274_v41 = vpop.xlane.xlu0 %273  ;;  %vm307_vm7 = vcmp.eq.f32.partialorder %v271_v40, inf  ;;  %v310_v59 = vand.u32 2147483648, %v271_v40  ;;  %vm309_vm8 = vcmp.eq.f32.partialorder %v271_v40, 0.0 }
 0x17e   : > { %461 = vrsqrt.f32 %v274_v41  ;;  %vm314_vm9 = vcmp.eq.f32.partialorder %v274_v41, inf  ;;  %v317_v62 = vand.u32 2147483648, %v274_v41  ;;  %vm316_vm10 = vcmp.eq.f32.partialorder %v274_v41, 0.0 }
 0x180   : > { %v277_v42 = vpop.xlane.xlu1 %276 }
 0x181   : > { %463 = vrsqrt.f32 %v277_v42  ;;  %v265_v43 = vpop.xlane.xlu0 %264  ;;  %vm321_vm11 = vcmp.eq.f32.partialorder %v277_v42, inf  ;;  %v324_v5 = vand.u32 2147483648, %v277_v42  ;;  %vm323_vm12 = vcmp.eq.f32.partialorder %v277_v42, 0.0 }
 0x182   : > { %465 = vrsqrt.f32 %v265_v43  ;;  %vm293_vm13 = vcmp.eq.f32.partialorder %v265_v43, inf  ;;  %v296_v8 = vand.u32 2147483648, %v265_v43  ;;  %vm295_vm14 = vcmp.eq.f32.partialorder %v265_v43, 0.0 }
 0x183   : > { %v456_v44 = vpop.eup %455 }
 0x184   : > { %v458_v45 = vpop.eup %457  ;;  %v299_v46 = vmul.f32 %v456_v44, %v268_v38  ;;  %v283_v47 = vpop.xlane.xlu1 %282 }
 0x185   : > { %v285_v49 = vmul.f32 %v458_v45, %v262_v39  ;;  %467 = vrsqrt.f32 %v283_v47  ;;  %v280_v50 = vpop.xlane.xlu0 %279  ;;  %vm335_vm15 = vcmp.eq.f32.partialorder %v283_v47, inf  ;;  %v338_v15 = vand.u32 2147483648, %v283_v47 }
 0x186   : > { %v301_v51 = vsel %vm300_vm3, %v268_v38, %v299_v46  ;;  %469 = vrsqrt.f32 %v280_v50  ;;  %vm337_vm0 = vcmp.eq.f32.partialorder %v283_v47, 0.0  ;;  %vm328_vm1 = vcmp.eq.f32.partialorder %v280_v50, inf }
 0x187   : > { %v460_v53 = vpop.eup %459  ;;  %v304_v54 = vsel %vm302_vm4, %v303_v48, %v301_v51  ;;  %v287_v55 = vsel %vm286_vm5, %v262_v39, %v285_v49  ;;  %v331_v18 = vand.u32 2147483648, %v280_v50  ;;  %vm330_vm3 = vcmp.eq.f32.partialorder %v280_v50, 0.0 }
 0x188   : > { %v462_v56 = vpop.eup %461  ;;  %343 = vst.msk [vmem:[%s533_s21 + $0x10] sm:$0xff] %vm340_vm2, %v304_v54  ;;  %v290_v57 = vsel %vm288_vm6, %v289_v52, %v287_v55  ;;  %v306_v58 = vmul.f32 %v460_v53, %v271_v40 }
 0x189   : > { %341 = vst.msk [vmem:[%s533_s21] sm:$0xff] %vm340_vm2, %v290_v57  ;;  %v313_v60 = vmul.f32 %v462_v56, %v274_v41 }
 0x18a   : > { %v308_v61 = vsel %vm307_vm7, %v271_v40, %v306_v58 }
 0x18b   : > { %v464_v63 = vpop.eup %463  ;;  %v311_v0 = vsel %vm309_vm8, %v310_v59, %v308_v61  ;;  %v315_v1 = vsel %vm314_vm9, %v274_v41, %v313_v60 }
 0x18c   : > { %v466_v2 = vpop.eup %465  ;;  %344 = vst.msk [vmem:[%s533_s21 + $0x18] sm:$0xff] %vm340_vm2, %v311_v0  ;;  %v318_v3 = vsel %vm316_vm10, %v317_v62, %v315_v1  ;;  %v320_v4 = vmul.f32 %v464_v63, %v277_v42 }
 0x18d   : > { %345 = vst.msk [vmem:[%s533_s21 + $0x20] sm:$0xff] %vm340_vm2, %v318_v3  ;;  %v292_v6 = vmul.f32 %v466_v2, %v265_v43 }
 0x18e   : > { %v322_v7 = vsel %vm321_vm11, %v277_v42, %v320_v4 }
 0x18f   : > { %v468_v9 = vpop.eup %467  ;;  %v325_v10 = vsel %vm323_vm12, %v324_v5, %v322_v7  ;;  %v294_v11 = vsel %vm293_vm13, %v265_v43, %v292_v6 }
 0x190   : > { %v470_v12 = vpop.eup %469  ;;  %346 = vst.msk [vmem:[%s533_s21 + $0x28] sm:$0xff] %vm340_vm2, %v325_v10  ;;  %v297_v13 = vsel %vm295_vm14, %v296_v8, %v294_v11  ;;  %v334_v14 = vmul.f32 %v468_v9, %v283_v47 }
 0x191   : > { %342 = vst.msk [vmem:[%s533_s21 + $0x8] sm:$0xff] %vm340_vm2, %v297_v13  ;;  %v327_v16 = vmul.f32 %v470_v12, %v280_v50 }
 0x192   : > { %v336_v17 = vsel %vm335_vm15, %v283_v47, %v334_v14 }
 0x193   : > { %v339_v19 = vsel %vm337_vm0, %v338_v15, %v336_v17  ;;  %v329_v20 = vsel %vm328_vm1, %v280_v50, %v327_v16 }
 0x194   : > { %348 = vst.msk [vmem:[%s533_s21 + $0x38] sm:$0xff] %vm340_vm2, %v339_v19  ;;  %v332_v21 = vsel %vm330_vm3, %v331_v18, %v329_v20 }
 0x195   : > { %347 = vst.msk [vmem:[%s533_s21 + $0x30] sm:$0xff] %vm340_vm2, %v332_v21 }
 0x196 PF: > { %s12_s9 = sadd.s32 1, %s477_s9  }
 0x197   : > { %p9_p4 = scmp.ge.s32.totalorder %s12_s9, 4  }
 0x199   :  { %11 = sbr.rel (!%p9_p4) target bundleno = 1 (0x1), region = 58 }

// kernel: fself_routing_2d.3
= control target key start
LH: loop header
LB: loop body
LE: loop exit
PB: predicated region body
PF: predicated region fallthrough
CT: control target
= control target key end

     0   :  { %8 = vsyncpa [#allocation3], 0  ;;  %s975_s0 = inlined_call_operand.vmem [shape: f32[2,64,32], index: 0, kind: input, shape index: {}]   ;;  %s976_s1 = inlined_call_operand.vmem [shape: bf16[32,16], index: 1, kind: input, shape index: {}]   ;;  %s977_s2 = inlined_call_operand.vmem [shape: f32[2,64,1], index: 2, kind: input, shape index: {}]   ;;  %s978_s3 = inlined_call_operand.hbm [shape: f32[2,4,16], index: 3, kind: output, shape index: {}]  }
   0x1   :  { %10 = vsyncpa [#allocation3 + $0x1], 0  ;;  %s780_s12 = smov 0   ;;  %s782_s13 = smov 0  }
   0x2   :  { %s784_s14 = smov 0   ;;  %s786_s15 = smov 0  }
   0x3 LB: > { %s801_s16 = sadd.s32 4294967295, %s756_s15   ;;  %s587_s17 = sadd.s32 4294967294, %s756_s15   ;;  %s756_s15 = sphi %s786_s15, %s984_s15   ;;  %s752_s14 = sphi %s784_s14, %s983_s14   ;;  %s748_s13 = sphi %s782_s13, %s982_s13   ;;  %s744_s12 = sphi %s780_s12, %s981_s12  }
   0x4   : > { %s805_s18 = sadd.s32 1, %s756_s15   ;;  %s96_s19 = sadd.s32 1, %s752_s14 }
   0x5   : > { %s93_s20 = ssub.s32 %s756_s15, %s805_s18  ;;  %p106_p0 = scmp.ne.s32.totalorder %s752_s14, %s748_s13 }
   0x6   : > { %p94_p1 = scmp.eq.s32.totalorder %s93_s20, 0  ;;  %p107_p2 = scmp.eq.s32.totalorder %s801_s16, 1 }
   0x7   : > { %p112_p3 = scmp.ne.s32.totalorder %s748_s13, %s744_s12  ;;  %p113_p4 = scmp.eq.s32.totalorder %s587_s17, 1 }
   0x8   : > { %s816_s21 = scalar_select %p94_p1, %s752_s14, %s96_s19  }
   0x9   : > { %p818_p5 = por %p107_p2, %p106_p0  ;;  %p822_p6 = por %p113_p4, %p112_p3 }
   0xa   : > { %p590_p7 = scmp.ge.s32.totalorder %s756_s15, 1  ;;  %p150_p8 = scmp.lt.s32.totalorder %s756_s15, 3 }
   0xc   : > { %p151_p9 = pnand %p590_p7, %p150_p8 }
   0xd   : > { %p179_p10 = scmp.lt.s32.totalorder (!%p151_p9), %s801_s16, 1  ;;  %v674_v0 = vld [vmem:[%s976_s1] sm:$0xff] (!%p151_p9)   ;;  %v675_v1 = vld [vmem:[%s976_s1 + $0x8] sm:$0xff] (!%p151_p9)   ;;  %vm218_vm0 = vcmask (!%p151_p9), 261120   ;;  %v758_v30 = vmov (!%p151_p9), 0   ;;  %vm470_vm2 = vcmask (!%p151_p9), 7168  }
   0xe   : > { %154 = sbr.rel (%p151_p9) target bundleno = 442 (0x1ba), region = 32  ;;  %614 = vmatprep.subr.bf16.mxu0 (!%p151_p9), %v674_v0  ;;  %626 = vmatprep.subr.bf16.mxu1 (!%p151_p9), %v674_v0  ;;  %s176_s10 = sand.u32 (!%p151_p9), 1, %s748_s13  }
   0xf   : > { %615 = vmatpush3.bf16.msra.mxu0 (!%p151_p9), %v674_v0  ;;  %628 = vmatpush3.bf16.msra.mxu1 (!%p151_p9), %v674_v0  ;;  %s591_s11 = sshll.u32 (!%p151_p9), %s176_s10, 2  ;;  %s603_s17 = sshll.u32 (!%p151_p9), %s801_s16, 6 }
  0x10   : > { %616 = vmatprep.subr.bf16.mxu0 (!%p151_p9), %v675_v1  ;;  %627 = vmatprep.subr.bf16.mxu1 (!%p151_p9), %v675_v1  ;;  %s178_s19 = scalar_lea.vmem (!%p151_p9), [#allocation2], %s591_s11  ;;  %s503_s27 = scalar_lea.sflag (!%p151_p9), [#allocation3], %s176_s10 }
  0x11   : > { %672 = vset.pattern.permute.xlu1 (!%p151_p9), %v758_v30  ;;  %673 = vset.pattern.permute.xlu0 (!%p151_p9), %v758_v30  ;;  %s516_s20 = sshll.u32 (!%p151_p9), %s178_s19, 4  ;;  %s935_s20 = int_to_ptr.vmem [resolvable:$true] %s516_s20 }
  0x12   : > { %s694_s28 = scalar_lea.vmem (!%p151_p9), %s935_s20, 64 }
  0x13   : > { %617 = vmatpush3.bf16.msra.mxu0 (!%p151_p9), %v675_v1  ;;  %629 = vmatpush3.bf16.msra.mxu1 (!%p151_p9), %v675_v1  ;;  %p695_p11 = scmp.ne.s32.totalorder (!%p151_p9), %s935_s20, %s694_s28 }
  0x15   : > { %s833_s26 = scalar_select %p179_p10, %s801_s16, 1 }
  0x16   : > { %p696_p12 = pnand %p695_p11, %p818_p5  ;;  %s759_s16 = smov [#allocation2]  }
  0x17   : > { %s606_s29 = sshll.u32 %s833_s26, 6  ;;  %s933_s26 = scalar_lea.hbm %s978_s3, %s603_s17 }
  0x18   : > { %s183_s5 = scalar_lea.vmem %s975_s0, %s606_s29  ;;  %s867_s8 = scalar_lea.vmem %s977_s2, %s606_s29 }
  0x19   : > { %v192_v2 = vld [vmem:[%s183_s5 + $0x10] sm:$0xff]  ;;  %v190_v3 = vld [vmem:[%s183_s5] sm:$0xff]  ;;  %v193_v4 = vld [vmem:[%s183_s5 + $0x18] sm:$0xff]  ;;  %p697_p13 = pneg %p696_p12  ;;  %s698_s29 = sshll.u32 %s759_s16, 4  ;;  %s699_s29 = int_to_ptr.vmem [resolvable:$false] %s698_s29 }
  0x1a   : > { %v298_v5 = vmul.f32 %v192_v2, %v192_v2  ;;  %v296_v6 = vmul.f32 %v190_v3, %v190_v3  ;;  %v299_v7 = vmul.f32 %v193_v4, %v193_v4  ;;  %v191_v8 = vld [vmem:[%s183_s5 + $0x8] sm:$0xff]  ;;  %v194_v10 = vld [vmem:[%s183_s5 + $0x20] sm:$0xff]  ;;  %v199_v11 = vpack.c.bf16 %v193_v4, %v192_v2  ;;  %v197_v18 = vld [vmem:[%s183_s5 + $0x38] sm:$0xff]  ;;  %s700_s30 = scalar_lea.vmem %s699_s29, 128  ;;  %p701_p0 = scmp.lt.s32.totalorder %s935_s20, %s699_s29 }
  0x1b   : > { %v195_v9 = vld [vmem:[%s183_s5 + $0x28] sm:$0xff]  ;;  %v297_v12 = vmul.f32 %v191_v8, %v191_v8  ;;  %v198_v13 = vpack.c.bf16 %v191_v8, %v190_v3  ;;  %v300_v17 = vmul.f32 %v194_v10, %v194_v10  ;;  %v196_v19 = vld [vmem:[%s183_s5 + $0x30] sm:$0xff]  ;;  %v303_v26 = vmul.f32 %v197_v18, %v197_v18  ;;  %v384_v44 = vld [vmem:[%s867_s8] sm:$0xff]  ;;  %p702_p1 = scmp.lt.s32.totalorder %s700_s30, %s694_s28 }
  0x1c   : > { %v310_v14 = vsel %vm218_vm0, %v298_v5, 0.0  ;;  %v304_v15 = vsel %vm218_vm0, %v296_v6, 0.0  ;;  %v301_v16 = vmul.f32 %v195_v9, %v195_v9  ;;  %v313_v20 = vsel %vm218_vm0, %v299_v7, 0.0  ;;  %v385_v55 = vld [vmem:[%s867_s8 + $0x8] sm:$0xff]  ;;  %v386_v57 = vld [vmem:[%s867_s8 + $0x10] sm:$0xff]  ;;  %v387_v2 = vld [vmem:[%s867_s8 + $0x18] sm:$0xff] }
  0x1d   : > { %311 = vadd.xlane.f32.xlu1 %v310_v14  ;;  %305 = vadd.xlane.f32.xlu0 %v304_v15  ;;  %v307_v21 = vsel %vm218_vm0, %v297_v12, 0.0  ;;  %v201_v22 = vpack.c.bf16 %v197_v18, %v196_v19  ;;  %v200_v23 = vpack.c.bf16 %v195_v9, %v194_v10  ;;  %v316_v25 = vsel %vm218_vm0, %v300_v17, 0.0  ;;  %v388_v8 = vld [vmem:[%s867_s8 + $0x20] sm:$0xff]  ;;  %p703_p2 = por %p702_p1, %p701_p0 }
  0x1e   : > { %618 = vmatprep.mubr.msk.bf16.mxu0 %vm218_vm0, %v198_v13  ;;  %v319_v24 = vsel %vm218_vm0, %v301_v16, 0.0  ;;  %v302_v27 = vmul.f32 %v196_v19, %v196_v19  ;;  %v325_v28 = vsel %vm218_vm0, %v303_v26, 0.0 }
  0x1f   : > { %619 = vmatmul.mubr.msk.bf16.vlgmr.msra.gmra.mrb[0].mxu0 %vm218_vm0, %v199_v11  ;;  %622 = vmatprep.mubr.msk.bf16.mxu1 %vm218_vm0, %v200_v23  ;;  %p704_p3 = pnand %p703_p2, %p697_p13 }
  0x20   : > { %623 = vmatmul.mubr.msk.bf16.vlgmr.msra.gmra.mrb[0].mxu1 %vm218_vm0, %v201_v22  ;;  %v322_v29 = vsel %vm218_vm0, %v302_v27, 0.0 }
  0x21   : > { %314 = vadd.xlane.f32.xlu1 %v313_v20  ;;  %308 = vadd.xlane.f32.xlu0 %v307_v21  ;;  %v389_v21 = vld [vmem:[%s867_s8 + $0x28] sm:$0xff] }
  0x25   : > { %320 = vadd.xlane.f32.xlu1 %v319_v24  ;;  %317 = vadd.xlane.f32.xlu0 %v316_v25 }
  0x29   : > { %326 = vadd.xlane.f32.xlu1 %v325_v28  ;;  %323 = vadd.xlane.f32.xlu0 %v322_v29  ;;  %v390_v28 = vld [vmem:[%s867_s8 + $0x30] sm:$0xff] }
  0xaa   : > { %v312_v31 = vpop.xlane.xlu1 %311  ;;  %v306_v32 = vpop.xlane.xlu0 %305 }
  0xab   : > { %676 = vrsqrt.f32 %v312_v31  ;;  %vm330_vm1 = vcmp.eq.f32.partialorder %v306_v32, inf  ;;  %vm332_vm3 = vcmp.eq.f32.partialorder %v306_v32, 0.0  ;;  %v333_v43 = vand.u32 2147483648, %v306_v32 }
  0xac   : > { %678 = vrsqrt.f32 %v306_v32  ;;  %vm344_vm4 = vcmp.eq.f32.partialorder %v312_v31, inf  ;;  %vm346_vm5 = vcmp.eq.f32.partialorder %v312_v31, 0.0  ;;  %v347_v48 = vand.u32 2147483648, %v312_v31 }
  0xae   : > { %v315_v33 = vpop.xlane.xlu1 %314  ;;  %v309_v34 = vpop.xlane.xlu0 %308 }
  0xaf   : > { %680 = vrsqrt.f32 %v315_v33  ;;  %vm337_vm6 = vcmp.eq.f32.partialorder %v309_v34, inf  ;;  %vm339_vm7 = vcmp.eq.f32.partialorder %v309_v34, 0.0  ;;  %v340_v53 = vand.u32 2147483648, %v309_v34 }
  0xb0   : > { %682 = vrsqrt.f32 %v309_v34  ;;  %vm351_vm8 = vcmp.eq.f32.partialorder %v315_v33, inf  ;;  %vm353_vm9 = vcmp.eq.f32.partialorder %v315_v33, 0.0  ;;  %v354_v59 = vand.u32 2147483648, %v315_v33 }
  0xb2   : > { %v856_v35 = vpop.xlane.xlu1 %320  ;;  %v858_v36 = vpop.xlane.xlu0 %317 }
  0xb3   : > { %684 = vrsqrt.f32 %v856_v35  ;;  %vm358_vm10 = vcmp.eq.f32.partialorder %v858_v36, inf  ;;  %vm360_vm11 = vcmp.eq.f32.partialorder %v858_v36, 0.0  ;;  %v361_v62 = vand.u32 2147483648, %v858_v36 }
  0xb4   : > { %686 = vrsqrt.f32 %v858_v36  ;;  %vm365_vm12 = vcmp.eq.f32.partialorder %v856_v35, inf  ;;  %vm367_vm13 = vcmp.eq.f32.partialorder %v856_v35, 0.0  ;;  %v368_v10 = vand.u32 2147483648, %v856_v35 }
  0xb5   : > { %v677_v37 = vpop.eup %676 }
  0xb6   : > { %v679_v38 = vpop.eup %678  ;;  %v869_v39 = vpop.xlane.xlu1 %326  ;;  %v343_v41 = vmul.f32 %v677_v37, %v312_v31 }
  0xb7   : > { %v871_v40 = vpop.xlane.xlu0 %323  ;;  %688 = vrsqrt.f32 %v869_v39  ;;  %v329_v42 = vmul.f32 %v679_v38, %v306_v32  ;;  %vm379_vm15 = vcmp.eq.f32.partialorder %v869_v39, inf  ;;  %v382_v27 = vand.u32 2147483648, %v869_v39 }
  0xb8   : > { %690 = vrsqrt.f32 %v871_v40  ;;  %v345_v47 = vsel %vm344_vm4, %v312_v31, %v343_v41  ;;  %vm372_vm14 = vcmp.eq.f32.partialorder %v871_v40, inf  ;;  %v375_v7 = vand.u32 2147483648, %v871_v40 }
  0xb9   : > { %v681_v45 = vpop.eup %680  ;;  %v331_v46 = vsel %vm330_vm1, %v306_v32, %v329_v42  ;;  %v348_v56 = vsel %vm346_vm5, %v347_v48, %v345_v47  ;;  %vm374_vm0 = vcmp.eq.f32.partialorder %v871_v40, 0.0  ;;  %vm381_vm1 = vcmp.eq.f32.partialorder %v869_v39, 0.0 }
  0xba   : > { %v683_v49 = vpop.eup %682  ;;  %v334_v50 = vsel %vm332_vm3, %v333_v43, %v331_v46  ;;  %v350_v51 = vmul.f32 %v681_v45, %v315_v33  ;;  %v394_v5 = vmul.f32 %v386_v57, %v348_v56  ;;  %vm500_vm4 = vcmask 125952  }
  0xbb   : > { %v336_v52 = vmul.f32 %v683_v49, %v309_v34  ;;  %v392_v54 = vmul.f32 %v384_v44, %v334_v50 }
  0xbc   : > { %v352_v58 = vsel %vm351_vm8, %v315_v33, %v350_v51  ;;  %v474_v23 = vsel %vm470_vm2, %v394_v5, 0.0 }
  0xbd   : > { %v685_v60 = vpop.eup %684  ;;  %v338_v61 = vsel %vm337_vm6, %v309_v34, %v336_v52  ;;  %402 = vperm.xlu1 %672, %v392_v54   ;;  %v355_v1 = vsel %vm353_vm9, %v354_v59, %v352_v58  ;;  %v471_v12 = vsel %vm470_vm2, %v392_v54, 0.0 }
  0xbe   : > { %v687_v63 = vpop.eup %686  ;;  %v341_v0 = vsel %vm339_vm7, %v340_v53, %v338_v61  ;;  %v364_v3 = vmul.f32 %v685_v60, %v856_v35  ;;  %v395_v14 = vmul.f32 %v387_v2, %v355_v1 }
  0xbf   : > { %v393_v4 = vmul.f32 %v385_v55, %v341_v0  ;;  %v357_v6 = vmul.f32 %v687_v63, %v858_v36 }
  0xc0   : > { %v366_v9 = vsel %vm365_vm12, %v856_v35, %v364_v3  ;;  %v476_v29 = vsel %vm470_vm2, %v395_v14, 0.0  ;;  %v391_v35 = vld [vmem:[%s867_s8 + $0x38] sm:$0xff] }
  0xc1   : > { %v689_v11 = vpop.eup %688  ;;  %v472_v13 = vsel %vm470_vm2, %v393_v4, 0.0  ;;  %412 = vperm.xlu1 %672, %v394_v5   ;;  %v359_v15 = vsel %vm358_vm10, %v858_v36, %v357_v6  ;;  %v369_v20 = vsel %vm367_vm13, %v368_v10, %v366_v9 }
  0xc2   : > { %v691_v16 = vpop.eup %690  ;;  %v378_v17 = vmul.f32 %v689_v11, %v869_v39  ;;  %v473_v18 = vadd.f32 %v472_v13, %v471_v12  ;;  %v362_v19 = vsel %vm360_vm11, %v361_v62, %v359_v15  ;;  %v397_v30 = vmul.f32 %v389_v21, %v369_v20 }
  0xc3   : > { %v371_v22 = vmul.f32 %v691_v16, %v871_v40  ;;  %v396_v24 = vmul.f32 %v388_v8, %v362_v19 }
  0xc4   : > { %v475_v25 = vadd.f32 %v474_v23, %v473_v18  ;;  %v380_v26 = vsel %vm379_vm15, %v869_v39, %v378_v17  ;;  %v480_v41 = vsel %vm470_vm2, %v397_v30, 0.0 }
  0xc5   : > { %417 = vperm.xlu1 %672, %v395_v14   ;;  %v373_v31 = vsel %vm372_vm14, %v871_v40, %v371_v22  ;;  %v383_v34 = vsel %vm381_vm1, %v382_v27, %v380_v26  ;;  %v478_v36 = vsel %vm470_vm2, %v396_v24, 0.0 }
  0xc6   : > { %v477_v32 = vadd.f32 %v476_v29, %v475_v25  ;;  %v376_v33 = vsel %vm374_vm0, %v375_v7, %v373_v31  ;;  %v399_v42 = vmul.f32 %v391_v35, %v383_v34 }
  0xc7   : > { %v398_v37 = vmul.f32 %v390_v28, %v376_v33 }
  0xc8   : > { %v479_v38 = vadd.f32 %v478_v36, %v477_v32  ;;  %v484_v40 = vsel %vm470_vm2, %v399_v42, 0.0 }
  0xc9   : > { %422 = vperm.xlu1 %672, %v396_v24   ;;  %v482_v44 = vsel %vm470_vm2, %v398_v37, 0.0  ;;  %vm448_vm2 = vcmask 130048  }
  0xca   : > { %v481_v43 = vadd.f32 %v480_v41, %v479_v38 }
  0xcc   : > { %v483_v45 = vadd.f32 %v482_v44, %v481_v43 }
  0xcd   : > { %427 = vperm.xlu1 %672, %v397_v30  }
  0xce   : > { %v485_v39 = vadd.f32 %v484_v40, %v483_v45 }
  0xd0   : > { %486 = vadd.xlane.f32.xlu0 %v485_v39 }
  0xd1   : > { %432 = vperm.xlu1 %672, %v398_v37  }
  0xd5   : > { %437 = vperm.xlu1 %672, %v399_v42  }
  0xe6   : > { %407 = vperm.xlu0 %673, %v393_v4  }
  0xf2   : > { %v620_v46 = vpop.f32.mrb[0].mxu0 }
  0xf3   : > { %v265_v47 = vpop.f32.mrb[1].mxu0  ;;  %v624_v49 = vpop.f32.mrb[0].mxu1 }
  0xf4   : > { %v621_v48 = vpop.f32.mrb[2].mxu0  ;;  %v281_v51 = vpop.f32.mrb[1].mxu1 }
  0xf5   : > { %v268_v50 = vpop.f32.mrb[3].mxu0  ;;  %v625_v52 = vpop.f32.mrb[2].mxu1 }
  0xf6   : > { %v284_v53 = vpop.f32.mrb[3].mxu1 }
 0x13c   : > { %v403_v54 = vpop.permute.xlu1 %402 }
 0x13d   : > { %v440_v63 = vmul.f32 %v403_v54, %v265_v47 }
 0x13f   : > { %v449_v6 = vsel %vm448_vm2, %v440_v63, 0.0 }
 0x140   : > { %v413_v55 = vpop.permute.xlu1 %412 }
 0x141   : > { %v442_v2 = vmul.f32 %v620_v46, %v413_v55 }
 0x143   : > { %v452_v11 = vsel %vm448_vm2, %v442_v2, 0.0 }
 0x144   : > { %v418_v56 = vpop.permute.xlu1 %417 }
 0x145   : > { %v443_v7 = vmul.f32 %v621_v48, %v418_v56 }
 0x147   : > { %v454_v14 = vsel %vm448_vm2, %v443_v7, 0.0 }
 0x148   : > { %v423_v57 = vpop.permute.xlu1 %422 }
 0x149   : > { %v444_v12 = vmul.f32 %v423_v57, %v281_v51 }
 0x14b   : > { %v456_v18 = vsel %vm448_vm2, %v444_v12, 0.0 }
 0x14c   : > { %v428_v61 = vpop.permute.xlu1 %427 }
 0x14d   : > { %v445_v15 = vmul.f32 %v428_v61, %v284_v53 }
 0x14f   : > { %v458_v21 = vsel %vm448_vm2, %v445_v15, 0.0 }
 0x150   : > { %v433_v5 = vpop.permute.xlu1 %432 }
 0x151   : > { %v446_v19 = vmul.f32 %v624_v49, %v433_v5 }
 0x153   : > { %v460_v24 = vsel %vm448_vm2, %v446_v19, 0.0 }
 0x154   : > { %v438_v16 = vpop.permute.xlu1 %437 }
 0x155   : > { %v447_v22 = vmul.f32 %v625_v52, %v438_v16 }
 0x157   : > { %v462_v26 = vsel %vm448_vm2, %v447_v22, 0.0 }
 0x15d   : > { %v487_v58 = vpop.xlane.xlu0 %486 }
 0x15e   : > { %v488_v59 = vrot.slane %v487_v58, 4 }
 0x160   : > { %v489_v60 = vadd.f32 %v488_v59, %v487_v58 }
 0x162   : > { %v490_v62 = vrot.slane %v489_v60, 2 }
 0x164   : > { %v491_v0 = vadd.f32 %v490_v62, %v489_v60 }
 0x165   : > { %v408_v1 = vpop.permute.xlu0 %407 }
 0x166   : > { %v441_v3 = vmul.f32 %v408_v1, %v268_v50  ;;  %v492_v4 = vrot.slane %v491_v0, 1 }
 0x168   : > { %v450_v8 = vsel %vm448_vm2, %v441_v3, 0.0  ;;  %v493_v9 = vadd.f32 %v492_v4, %v491_v0 }
 0x169   : > { %v451_v10 = vadd.f32 %v450_v8, %v449_v6 }
 0x16a   : > { %630 = vpush %v493_v9 }
 0x16b   : > { %v453_v13 = vadd.f32 %v452_v11, %v451_v10 }
 0x16d   : > { %v455_v17 = vadd.f32 %v454_v14, %v453_v13 }
 0x16f   : > { %v457_v20 = vadd.f32 %v456_v18, %v455_v17 }
 0x171   : > { %v459_v23 = vadd.f32 %v458_v21, %v457_v20 }
 0x173   : > { %v461_v25 = vadd.f32 %v460_v24, %v459_v23 }
 0x175   : > { %v463_v27 = vadd.f32 %v462_v26, %v461_v25 }
 0x177   : > { %v464_v28 = vrot.slane %v463_v27, 4 }
 0x179   : > { %v465_v29 = vadd.f32 %v464_v28, %v463_v27 }
 0x17b   : > { %v466_v31 = vrot.slane %v465_v29, 2 }
 0x17d   : > { %v467_v33 = vadd.f32 %v466_v31, %v465_v29 }
 0x17f   : > { %v468_v34 = vrot.slane %v467_v33, 1 }
 0x181   : > { %v469_v35 = vadd.f32 %v468_v34, %v467_v33 }
 0x19b   : > { %s631_s9 = spop %630 }
 0x19c   : > { %v495_v30 = vstv %s631_s9 }
 0x19d   : > { %vm496_vm3 = vcmp.gt.f32.partialorder %v495_v30, 0.0 }
 0x19e   : > { %v497_v32 = vsel %vm496_vm3, %v495_v30, 1.0 }
 0x19f   : > { %692 = vrcp.f32 %v497_v32 }
 0x1a9   : > { %v693_v36 = vpop.eup %692 }
 0x1aa   : > { %v499_v37 = vmul.f32 %v693_v36, %v469_v35 }
 0x1ac   : > { %501 = vst.msk [vmem:[%s178_s19] sm:$0xf] %vm500_vm4, %v499_v37 }
 0x1ad   : > { %707 = shalt.err (!%p704_p3)
}
 0x1ae   : > { %s708_s4 = scalar_lea.hbm %s933_s26, 64  ;;  %s712_s7 = scalar_lea.hbm %s978_s3, 128 }
 0x1af   : > { %p709_p4 = scmp.ne.s32.totalorder %s933_s26, %s708_s4  ;;  %p713_p9 = scmp.lt.u32.totalorder %s933_s26, %s978_s3 }
 0x1b0   : > { %p714_p10 = scmp.lt.u32.totalorder %s712_s7, %s708_s4  ;;  %p716_p12 = scmp.lt.u32.totalorder %s708_s4, %s933_s26 }
 0x1b1   : > { %p710_p7 = pnand %p709_p4, %p818_p5 }
 0x1b2   : > { %p715_p11 = por %p714_p10, %p713_p9 }
 0x1b3   : > { %p711_p8 = pneg %p710_p7 }
 0x1b4   : > { %p717_p13 = por %p716_p12, %p715_p11 }
 0x1b6   : > { %p718_p0 = pnand %p717_p13, %p711_p8 }
 0x1b8   : > { %721 = shalt.err (!%p718_p0)
}
 0x1b9   : > { %632 = dma.vmem_to_hbm [thread:$0]  (%p818_p5), %s935_s20, 64, %s933_s26, %s503_s27  }
 0x1ba PF: > { %p638_p1 = scmp.ge.s32.totalorder %s756_s15, 2  ;;  %s528_s10 = sand.u32 1, %s744_s12  }
 0x1bb   : > { %s529_s11 = scalar_lea.sflag [#allocation3], %s528_s10 }
 0x1bc   : > { %p635_p2 = pnand %p638_p1, %p822_p6 }
 0x1be   : > { %739 = dma.done.wait (!%p635_p2), %s529_s11, 64  }
 0x1bf   : > { %741 = vsyncadd (!%p635_p2), %s529_s11, 4294967232  ;;  %p13_p3 = scmp.ge.s32.totalorder %s805_s18, 4   ;;  %s981_s12 = smov %s748_s13 }
 0x1c0   : > { %s982_s13 = smov %s752_s14  ;;  %s983_s14 = smov %s816_s21 }
 0x1c1   : > { %s984_s15 = smov %s805_s18  ;;  %15 = sbr.rel (!%p13_p3) target bundleno = 3 (0x3), region = 70 }
 0x1c8   :  { %534 = vsyncpa [#allocation3], 1 }
 0x1c9   :  { %536 = vsyncpa [#allocation3 + $0x1], 1 }

</bundles_post_ra>
